<compile_context>
chip_gen: v5e
topology: v5e:2x2
jax: 0.10.0
libtpu: 0.0.40
codegen_flags: <defaults>
</compile_context>

<pallas_src>
import functools

import jax
import jax.numpy as jnp
import numpy as np
from jax.experimental import pallas as pl
from jax.experimental.pallas import tpu as pltpu


def _round_up(x, m):
    return (x + m - 1) // m * m


def _feature_volume_kernel(coords_ref, zy_rows_ref, x_row_ref, expand_ref,
                           table_ref, out_ref, *, side):
    size_m1 = float(side - 1)
    c = coords_ref[...]                                   # (TN, 3) f32 in [-1, 1]

    def unnorm(u):
        # align_corners=True unnormalize + padding_mode='border' clamp
        return jnp.clip((u + 1.0) * 0.5 * size_m1, 0.0, size_m1)

    fx = unnorm(c[:, 0:1])                                # (TN, 1)
    fy = unnorm(c[:, 1:2])
    fz = unnorm(c[:, 2:3])

    def hat(grid_row, f):
        # Linear-interpolation "tent" weight: relu(1 - |g - f|).
        # Equals (1 - t) at floor(f), t at floor(f)+1, 0 elsewhere; at the
        # clamped border it collapses to weight 1 on the edge node.
        return jnp.maximum(1.0 - jnp.abs(grid_row - f), 0.0)

    # (z, y) factor in the small (TN, D*H) space: 2 hats + 1 multiply.
    w_zy = hat(zy_rows_ref[0:1, :], fz) * hat(zy_rows_ref[1:2, :], fy)

    # Expand zy-weights to the flattened-volume width on the MXU (0/1 matrix):
    # w_zy_full[n, v] = w_zy[n, v // W]   (0 on padded columns).
    w_zy_full = jnp.dot(w_zy, expand_ref[...],
                        preferred_element_type=jnp.float32)   # (TN, V_pad)

    # x factor directly at full width (4 passes) + 1 multiply.
    wmat = w_zy_full * hat(x_row_ref[...], fx)                # (TN, V_pad)

    # Final MXU contraction against the feature table: (TN, V_pad) @ (V_pad, fdim)
    out_ref[...] = jnp.dot(wmat, table_ref[...],
                           preferred_element_type=jnp.float32)


def _sample_pallas(coords, zy_rows, x_row, expand, table, *, side, fdim,
                   tn_max=512):
    """coords: (N, 3) f32 -> (N, fdim) f32 trilinear samples."""
    N = coords.shape[0]
    # Large tiles amortize per-grid-step overhead; shrink for tiny N so padded
    # rows don't dominate.  tn stays a multiple of 8 (sublane tiling).
    tn = min(tn_max, _round_up(N, 8))
    N_pad = _round_up(N, tn)

    coords_p = jnp.pad(coords.astype(jnp.float32), ((0, N_pad - N), (0, 0)))

    DH_pad = zy_rows.shape[1]
    V_pad = x_row.shape[1]

    kernel = functools.partial(_feature_volume_kernel, side=side)

    out = pl.pallas_call(
        kernel,
        out_shape=jax.ShapeDtypeStruct((N_pad, fdim), jnp.float32),
        grid_spec=pltpu.PrefetchScalarGridSpec(
            num_scalar_prefetch=0,
            grid=(N_pad // tn,),
            in_specs=[
                pl.BlockSpec((tn, 3), lambda i: (i, 0)),
                # Constant (grid-invariant) operands: resident table rows /
                # expansion matrix.  TODO(synk): for large fsize the dense
                # over-V design (and this expansion matrix) should be replaced
                # by a V-tiled accumulator or a DMA gather of the 8 corner rows.
                pl.BlockSpec((2, DH_pad), lambda i: (0, 0)),
                pl.BlockSpec((1, V_pad), lambda i: (0, 0)),
                pl.BlockSpec((DH_pad, V_pad), lambda i: (0, 0)),
                pl.BlockSpec((V_pad, fdim), lambda i: (0, 0)),
            ],
            out_specs=pl.BlockSpec((tn, fdim), lambda i: (i, 0)),
        ),
        compiler_params=pltpu.CompilerParams(
            dimension_semantics=("parallel",),          # megacore-shardable
            vmem_limit_bytes=48 * 1024 * 1024,          # headroom for big tiles
        ),
    )(coords_p, zy_rows, x_row, expand, table)
    return out[:N]


class FeatureVolume:
    """JAX/Pallas port of sdf-net OctreeSDF_VC.FeatureVolume (forward only)."""

    def __init__(self, fdim, fsize, key):
        self.fdim = fdim
        self.fsize = fsize
        side = fsize + 1
        self.side = side

        # nn.Parameter(torch.randn(1, fdim, s, s, s) * 0.01), deterministic here.
        self.fm = 0.01 * jax.random.normal(
            key, (1, fdim, side, side, side), dtype=jnp.float32)

        V = side ** 3
        DH = side ** 2
        V_pad = _round_up(V, 128)
        DH_pad = _round_up(DH, 128)

        # Feature table: flatten (D, H, W) -> V with v = z*H*W + y*W + x,
        # channels last, zero-padded rows.  Built once (hoisted out of forward).
        tbl = jnp.transpose(self.fm[0].reshape(fdim, V), (1, 0))
        self.table = jnp.pad(tbl, ((0, V_pad - V), (0, 0)))

        # Per-lane grid coordinates for the hat-function weight build.
        v = np.arange(V)
        x_row = np.full((1, V_pad), -2.0, dtype=np.float32)
        x_row[0, :V] = (v % side).astype(np.float32)

        zy = np.arange(DH)
        zy_rows = np.full((2, DH_pad), -2.0, dtype=np.float32)
        zy_rows[0, :DH] = (zy // side).astype(np.float32)   # z index of zy
        zy_rows[1, :DH] = (zy % side).astype(np.float32)    # y index of zy

        # (zy -> v) expansion matrix: expand[zy, v] = 1 iff v // W == zy.
        expand = np.zeros((DH_pad, V_pad), dtype=np.float32)
        expand[v // side, v] = 1.0

        self.x_row = jnp.asarray(x_row)
        self.zy_rows = jnp.asarray(zy_rows)
        self.expand = jnp.asarray(expand)

    def __call__(self, x):
        if x.ndim == 2 and x.shape[1] == 3:
            # grid_sample(...)[0, :, :, 0, 0].transpose(0, 1) -> (N, fdim)
            return _sample_pallas(x, self.zy_rows, self.x_row, self.expand,
                                  self.table, side=self.side, fdim=self.fdim)
        # else-branch: x is (N, K, 3); grid_sample output permuted to (N, K, fdim).
        # TODO(synk): the PyTorch else-branch also prints debug info; only the
        # numeric (N, K, fdim) sampling path is reproduced here.
        N, K, _ = x.shape
        flat = _sample_pallas(x.reshape(N * K, 3), self.zy_rows, self.x_row,
                              self.expand, self.table, side=self.side,
                              fdim=self.fdim)
        return flat.reshape(N, K, self.fdim)


def _reference_forward(fm, coords):
    """Pure-JAX reference of F.grid_sample 3D, bilinear, align_corners=True, border."""
    _, C, D, H, W = fm.shape
    vol = fm[0]                                  # (C, D, H, W)

    def unnorm(u, size):
        return jnp.clip((u + 1.0) * 0.5 * (size - 1), 0.0, float(size - 1))

    fx = unnorm(coords[:, 0], W)
    fy = unnorm(coords[:, 1], H)
    fz = unnorm(coords[:, 2], D)
    x0f, y0f, z0f = jnp.floor(fx), jnp.floor(fy), jnp.floor(fz)
    tx, ty, tz = fx - x0f, fy - y0f, fz - z0f
    x0, y0, z0 = (x0f.astype(jnp.int32), y0f.astype(jnp.int32),
                  z0f.astype(jnp.int32))
    x1 = jnp.minimum(x0 + 1, W - 1)
    y1 = jnp.minimum(y0 + 1, H - 1)
    z1 = jnp.minimum(z0 + 1, D - 1)

    def g(zi, yi, xi):
        return vol[:, zi, yi, xi].T              # (N, C)

    tx, ty, tz = tx[:, None], ty[:, None], tz[:, None]
    out = ((1 - tz) * ((1 - ty) * ((1 - tx) * g(z0, y0, x0) + tx * g(z0, y0, x1))
                       + ty * ((1 - tx) * g(z0, y1, x0) + tx * g(z0, y1, x1)))
           + tz * ((1 - ty) * ((1 - tx) * g(z1, y0, x0) + tx * g(z1, y0, x1))
                   + ty * ((1 - tx) * g(z1, y1, x0) + tx * g(z1, y1, x1))))
    return out


if __name__ == "__main__":
    fdim, fsize, N = 32, 8, 16

    key = jax.random.PRNGKey(0)
    k_fm, k_x = jax.random.split(key)

    module = FeatureVolume(fdim, fsize, k_fm)

    # Points in [-1, 1]^3, plus exact-corner points to exercise border clamping.
    x = jax.random.uniform(k_x, (N - 2, 3), minval=-1.0, maxval=1.0,
                           dtype=jnp.float32)
    x = jnp.concatenate(
        [x,
         jnp.array([[1.0, 1.0, 1.0], [-1.0, -1.0, -1.0]], dtype=jnp.float32)],
        axis=0)

    out = module(x)
    out = jax.block_until_ready(out)
    assert out.shape == (N, fdim), out.shape

    ref = _reference_forward(module.fm, x)
    np.testing.assert_allclose(np.asarray(out), np.asarray(ref),
                               rtol=1e-4, atol=1e-5)

    # Also exercise the (N, K, 3) branch (shape-only check).
    xk = x[:15].reshape(5, 3, 3)
    out_k = jax.block_until_ready(module(xk))
    assert out_k.shape == (5, 3, fdim), out_k.shape
    ref_k = _reference_forward(module.fm, xk.reshape(-1, 3)).reshape(5, 3, fdim)
    np.testing.assert_allclose(np.asarray(out_k), np.asarray(ref_k),
                               rtol=1e-4, atol=1e-5)

    print("KERNEL_OK")
</pallas_src>

<mosaic_0001>
module attributes {stable_mosaic.version = 11 : i64} {
  func.func @_feature_volume_kernel(%arg0: i32, %arg1: memref<16x3xf32, #tpu.memory_space<vmem>>, %arg2: memref<2x128xf32, #tpu.memory_space<vmem>>, %arg3: memref<1x768xf32, #tpu.memory_space<vmem>>, %arg4: memref<128x768xf32, #tpu.memory_space<vmem>>, %arg5: memref<768x32xf32, #tpu.memory_space<vmem>>, %arg6: memref<16x32xf32, #tpu.memory_space<vmem>>) attributes {dimension_semantics = [#tpu.dimension_semantics<parallel>], iteration_bounds = array<i64: 1>, scalar_prefetch = 0 : i64, scratch_operands = 0 : i64, tpu.core_type = #tpu.core_type<tc>, window_params = [{transform_indices = @transform_0, window_bounds = array<i64: 16, 3>}, {pipeline_mode = #tpu.pipeline_mode<synchronous>, transform_indices = @transform_1, window_bounds = array<i64: 2, 128>}, {pipeline_mode = #tpu.pipeline_mode<synchronous>, transform_indices = @transform_2, window_bounds = array<i64: 1, 768>}, {pipeline_mode = #tpu.pipeline_mode<synchronous>, transform_indices = @transform_3, window_bounds = array<i64: 128, 768>}, {pipeline_mode = #tpu.pipeline_mode<synchronous>, transform_indices = @transform_4, window_bounds = array<i64: 768, 32>}, {transform_indices = @transform_5, window_bounds = array<i64: 16, 32>}]} {
    %c0 = arith.constant 0 : index
    %c0_0 = arith.constant 0 : index
    %0 = vector.load %arg1[%c0, %c0_0] : memref<16x3xf32, #tpu.memory_space<vmem>>, vector<16x3xf32>
    %1 = vector.extract_strided_slice %0 {offsets = [0, 0], sizes = [16, 1], strides = [1, 1]} : vector<16x3xf32> to vector<16x1xf32>
    %cst = arith.constant 1.000000e+00 : f32
    %2 = vector.broadcast %cst : f32 to vector<16x1xf32>
    %3 = arith.addf %1, %2 : vector<16x1xf32>
    %cst_1 = arith.constant 5.000000e-01 : f32
    %4 = vector.broadcast %cst_1 : f32 to vector<16x1xf32>
    %5 = arith.mulf %3, %4 : vector<16x1xf32>
    %cst_2 = arith.constant 8.000000e+00 : f32
    %6 = vector.broadcast %cst_2 : f32 to vector<16x1xf32>
    %7 = arith.mulf %5, %6 : vector<16x1xf32>
    %cst_3 = arith.constant 0.000000e+00 : f32
    %cst_4 = arith.constant 8.000000e+00 : f32
    %8 = vector.broadcast %cst_3 : f32 to vector<16x1xf32>
    %9 = arith.maximumf %8, %7 : vector<16x1xf32>
    %10 = vector.broadcast %cst_4 : f32 to vector<16x1xf32>
    %11 = arith.minimumf %10, %9 : vector<16x1xf32>
    %12 = vector.extract_strided_slice %0 {offsets = [0, 1], sizes = [16, 1], strides = [1, 1]} : vector<16x3xf32> to vector<16x1xf32>
    %cst_5 = arith.constant 1.000000e+00 : f32
    %13 = vector.broadcast %cst_5 : f32 to vector<16x1xf32>
    %14 = arith.addf %12, %13 : vector<16x1xf32>
    %cst_6 = arith.constant 5.000000e-01 : f32
    %15 = vector.broadcast %cst_6 : f32 to vector<16x1xf32>
    %16 = arith.mulf %14, %15 : vector<16x1xf32>
    %cst_7 = arith.constant 8.000000e+00 : f32
    %17 = vector.broadcast %cst_7 : f32 to vector<16x1xf32>
    %18 = arith.mulf %16, %17 : vector<16x1xf32>
    %cst_8 = arith.constant 0.000000e+00 : f32
    %cst_9 = arith.constant 8.000000e+00 : f32
    %19 = vector.broadcast %cst_8 : f32 to vector<16x1xf32>
    %20 = arith.maximumf %19, %18 : vector<16x1xf32>
    %21 = vector.broadcast %cst_9 : f32 to vector<16x1xf32>
    %22 = arith.minimumf %21, %20 : vector<16x1xf32>
    %23 = vector.extract_strided_slice %0 {offsets = [0, 2], sizes = [16, 1], strides = [1, 1]} : vector<16x3xf32> to vector<16x1xf32>
    %cst_10 = arith.constant 1.000000e+00 : f32
    %24 = vector.broadcast %cst_10 : f32 to vector<16x1xf32>
    %25 = arith.addf %23, %24 : vector<16x1xf32>
    %cst_11 = arith.constant 5.000000e-01 : f32
    %26 = vector.broadcast %cst_11 : f32 to vector<16x1xf32>
    %27 = arith.mulf %25, %26 : vector<16x1xf32>
    %cst_12 = arith.constant 8.000000e+00 : f32
    %28 = vector.broadcast %cst_12 : f32 to vector<16x1xf32>
    %29 = arith.mulf %27, %28 : vector<16x1xf32>
    %cst_13 = arith.constant 0.000000e+00 : f32
    %cst_14 = arith.constant 8.000000e+00 : f32
    %30 = vector.broadcast %cst_13 : f32 to vector<16x1xf32>
    %31 = arith.maximumf %30, %29 : vector<16x1xf32>
    %32 = vector.broadcast %cst_14 : f32 to vector<16x1xf32>
    %33 = arith.minimumf %32, %31 : vector<16x1xf32>
    %c0_15 = arith.constant 0 : index
    %c0_16 = arith.constant 0 : index
    %34 = vector.load %arg2[%c0_15, %c0_16] : memref<2x128xf32, #tpu.memory_space<vmem>>, vector<1x128xf32>
    %35 = vector.broadcast %34 : vector<1x128xf32> to vector<16x128xf32>
    %36 = vector.broadcast %33 : vector<16x1xf32> to vector<16x128xf32>
    %37 = arith.subf %35, %36 : vector<16x128xf32>
    %38 = math.absf %37 : vector<16x128xf32>
    %cst_17 = arith.constant 1.000000e+00 : f32
    %39 = vector.broadcast %cst_17 : f32 to vector<16x128xf32>
    %40 = arith.subf %39, %38 : vector<16x128xf32>
    %cst_18 = arith.constant 0.000000e+00 : f32
    %41 = vector.broadcast %cst_18 : f32 to vector<16x128xf32>
    %42 = arith.maximumf %40, %41 : vector<16x128xf32>
    %c1 = arith.constant 1 : index
    %c0_19 = arith.constant 0 : index
    %43 = vector.load %arg2[%c1, %c0_19] : memref<2x128xf32, #tpu.memory_space<vmem>>, vector<1x128xf32>
    %44 = vector.broadcast %43 : vector<1x128xf32> to vector<16x128xf32>
    %45 = vector.broadcast %22 : vector<16x1xf32> to vector<16x128xf32>
    %46 = arith.subf %44, %45 : vector<16x128xf32>
    %47 = math.absf %46 : vector<16x128xf32>
    %cst_20 = arith.constant 1.000000e+00 : f32
    %48 = vector.broadcast %cst_20 : f32 to vector<16x128xf32>
    %49 = arith.subf %48, %47 : vector<16x128xf32>
    %cst_21 = arith.constant 0.000000e+00 : f32
    %50 = vector.broadcast %cst_21 : f32 to vector<16x128xf32>
    %51 = arith.maximumf %49, %50 : vector<16x128xf32>
    %52 = arith.mulf %42, %51 : vector<16x128xf32>
    %c0_22 = arith.constant 0 : index
    %c0_23 = arith.constant 0 : index
    %53 = vector.load %arg4[%c0_22, %c0_23] : memref<128x768xf32, #tpu.memory_space<vmem>>, vector<128x768xf32>
    %cst_24 = arith.constant dense<0.000000e+00> : vector<16x768xf32>
    %54 = tpu.matmul %52, %53, %cst_24 {dimension_numbers = #tpu.dot_dimension_numbers<[1], [0], [0], [1], [0, 0, 1, 1], [], []>} : vector<16x128xf32>, vector<128x768xf32>, vector<16x768xf32> -> vector<16x768xf32>
    %c0_25 = arith.constant 0 : index
    %c0_26 = arith.constant 0 : index
    %55 = vector.load %arg3[%c0_25, %c0_26] : memref<1x768xf32, #tpu.memory_space<vmem>>, vector<1x768xf32>
    %56 = vector.broadcast %55 : vector<1x768xf32> to vector<16x768xf32>
    %57 = vector.broadcast %11 : vector<16x1xf32> to vector<16x768xf32>
    %58 = arith.subf %56, %57 : vector<16x768xf32>
    %59 = math.absf %58 : vector<16x768xf32>
    %cst_27 = arith.constant 1.000000e+00 : f32
    %60 = vector.broadcast %cst_27 : f32 to vector<16x768xf32>
    %61 = arith.subf %60, %59 : vector<16x768xf32>
    %cst_28 = arith.constant 0.000000e+00 : f32
    %62 = vector.broadcast %cst_28 : f32 to vector<16x768xf32>
    %63 = arith.maximumf %61, %62 : vector<16x768xf32>
    %64 = arith.mulf %54, %63 : vector<16x768xf32>
    %c0_29 = arith.constant 0 : index
    %c0_30 = arith.constant 0 : index
    %65 = vector.load %arg5[%c0_29, %c0_30] : memref<768x32xf32, #tpu.memory_space<vmem>>, vector<768x32xf32>
    %cst_31 = arith.constant dense<0.000000e+00> : vector<16x32xf32>
    %66 = tpu.matmul %64, %65, %cst_31 {dimension_numbers = #tpu.dot_dimension_numbers<[1], [0], [0], [1], [0, 0, 1, 1], [], []>} : vector<16x768xf32>, vector<768x32xf32>, vector<16x32xf32> -> vector<16x32xf32>
    %c0_32 = arith.constant 0 : index
    %c0_33 = arith.constant 0 : index
    %67 = vector.load %arg6[%c0_32, %c0_33] : memref<16x32xf32, #tpu.memory_space<vmem>>, vector<16x32xf32>
    tpu.vector_store %arg6[%c0_32, %c0_33], %66 {strides = array<i32>} : memref<16x32xf32, #tpu.memory_space<vmem>>, vector<16x32xf32>,
    return
  }
  func.func @transform_0(%arg0: i32) -> (i32, i32) {
    %c0_i32 = arith.constant 0 : i32
    %c0_i32_0 = arith.constant 0 : i32
    return %arg0, %c0_i32 : i32, i32
  }
  func.func @transform_1(%arg0: i32) -> (i32, i32) {
    %c0_i32 = arith.constant 0 : i32
    %c0_i32_0 = arith.constant 0 : i32
    %c0_i32_1 = arith.constant 0 : i32
    return %c0_i32, %c0_i32_0 : i32, i32
  }
  func.func @transform_2(%arg0: i32) -> (i32, i32) {
    %c0_i32 = arith.constant 0 : i32
    %c0_i32_0 = arith.constant 0 : i32
    %c0_i32_1 = arith.constant 0 : i32
    return %c0_i32, %c0_i32_0 : i32, i32
  }
  func.func @transform_3(%arg0: i32) -> (i32, i32) {
    %c0_i32 = arith.constant 0 : i32
    %c0_i32_0 = arith.constant 0 : i32
    %c0_i32_1 = arith.constant 0 : i32
    return %c0_i32, %c0_i32_0 : i32, i32
  }
  func.func @transform_4(%arg0: i32) -> (i32, i32) {
    %c0_i32 = arith.constant 0 : i32
    %c0_i32_0 = arith.constant 0 : i32
    %c0_i32_1 = arith.constant 0 : i32
    return %c0_i32, %c0_i32_0 : i32, i32
  }
  func.func @transform_5(%arg0: i32) -> (i32, i32) {
    %c0_i32 = arith.constant 0 : i32
    %c0_i32_0 = arith.constant 0 : i32
    return %arg0, %c0_i32 : i32, i32
  }
}

</mosaic_0001>

<bundles_post_ra>
// kernel: tpu_custom_call.1
= control target key start
LH: loop header
LB: loop body
LE: loop exit
PB: predicated region body
PF: predicated region fallthrough
CT: control target
= control target key end

     0   :  { %v684_v3 = vmov 2   ;;  %s1332_s0 = inlined_call_operand.vmem [shape: f32[16,3], index: 0, kind: input, shape index: {}]   ;;  %s1333_s1 = inlined_call_operand.vmem [shape: f32[2,128], index: 1, kind: input, shape index: {}]   ;;  %s1334_s2 = inlined_call_operand.vmem [shape: f32[1,768], index: 2, kind: input, shape index: {}]   ;;  %s1335_s3 = inlined_call_operand.vmem [shape: f32[128,768], index: 3, kind: input, shape index: {}]   ;;  %s1336_s4 = inlined_call_operand.vmem [shape: f32[768,32], index: 4, kind: input, shape index: {}]   ;;  %s1337_s5 = inlined_call_operand.hbm [shape: f32[16,32], index: 5, kind: output, shape index: {}]  }
   0x1   :  { %v22_v0 = vld [vmem:[%s1332_s0 + $0x8] sm:$0xff]  ;;  %v21_v1 = vld [vmem:[%s1332_s0] sm:$0xff]  ;;  %v163_v2 = vld [vmem:[%s1335_s3 + $0x2d0] sm:$0xff]  ;;  %652 = vset.pattern.permute.xlu1 %v684_v3  ;;  %650 = vset.pattern.permute.xlu0 %v684_v3 }
   0x2   :  { %v24_v4 = vadd.f32 1.0, %v22_v0  ;;  %v23_v5 = vadd.f32 1.0, %v21_v1  ;;  %v164_v6 = vld [vmem:[%s1335_s3 + $0x2d8] sm:$0xff]  ;;  %v157_v7 = vld [vmem:[%s1335_s3 + $0x2a0] sm:$0xff]  ;;  %v158_v8 = vld [vmem:[%s1335_s3 + $0x2a8] sm:$0xff]  ;;  %169 = vmatpush.msra.mxu0 %v163_v2 }
   0x3   :  { %192 = vmatpush.msra.mxu1 %v164_v6  ;;  %v151_v11 = vld [vmem:[%s1335_s3 + $0x270] sm:$0xff]  ;;  %v152_v12 = vld [vmem:[%s1335_s3 + $0x278] sm:$0xff]  ;;  %v145_v15 = vld [vmem:[%s1335_s3 + $0x240] sm:$0xff] }
   0x4   :  { %v26_v9 = vmul.f32 0.5, %v24_v4  ;;  %v25_v10 = vmul.f32 0.5, %v23_v5  ;;  %170 = vmatpush.msra.mxu0 %v157_v7  ;;  %v146_v16 = vld [vmem:[%s1335_s3 + $0x248] sm:$0xff]  ;;  %v139_v17 = vld [vmem:[%s1335_s3 + $0x210] sm:$0xff]  ;;  %v165_v18 = vld [vmem:[%s1335_s3 + $0x2e0] sm:$0xff] }
   0x5   :  { %193 = vmatpush.msra.mxu1 %v158_v8  ;;  %v166_v19 = vld [vmem:[%s1335_s3 + $0x2e8] sm:$0xff]  ;;  %v140_v22 = vld [vmem:[%s1335_s3 + $0x218] sm:$0xff]  ;;  %215 = vmatpush.msra.mxu2 %v165_v18  ;;  %v159_v23 = vld [vmem:[%s1335_s3 + $0x2b0] sm:$0xff] }
   0x6   :  { %v28_v13 = vmul.f32 8.0, %v26_v9  ;;  %v27_v14 = vmul.f32 8.0, %v25_v10  ;;  %171 = vmatpush.msra.mxu0 %v151_v11  ;;  %238 = vmatpush.msra.mxu3 %v166_v19  ;;  %v160_v24 = vld [vmem:[%s1335_s3 + $0x2b8] sm:$0xff]  ;;  %v133_v27 = vld [vmem:[%s1335_s3 + $0x1e0] sm:$0xff]  ;;  %v134_v28 = vld [vmem:[%s1335_s3 + $0x1e8] sm:$0xff] }
   0x7   :  { %194 = vmatpush.msra.mxu1 %v152_v12  ;;  %216 = vmatpush.msra.mxu2 %v159_v23  ;;  %v153_v29 = vld [vmem:[%s1335_s3 + $0x280] sm:$0xff]  ;;  %v154_v30 = vld [vmem:[%s1335_s3 + $0x288] sm:$0xff]  ;;  %v127_v31 = vld [vmem:[%s1335_s3 + $0x1b0] sm:$0xff] }
   0x8   :  { %v30_v20 = vmax.f32 %v28_v13, 0.0  ;;  %v29_v21 = vmax.f32 %v27_v14, 0.0  ;;  %172 = vmatpush.msra.mxu0 %v145_v15  ;;  %239 = vmatpush.msra.mxu3 %v160_v24  ;;  %v128_v32 = vld [vmem:[%s1335_s3 + $0x1b8] sm:$0xff]  ;;  %v147_v33 = vld [vmem:[%s1335_s3 + $0x250] sm:$0xff]  ;;  %v121_v35 = vld [vmem:[%s1335_s3 + $0x180] sm:$0xff] }
   0x9   :  { %195 = vmatpush.msra.mxu1 %v146_v16  ;;  %v148_v34 = vld [vmem:[%s1335_s3 + $0x258] sm:$0xff]  ;;  %v122_v36 = vld [vmem:[%s1335_s3 + $0x188] sm:$0xff]  ;;  %217 = vmatpush.msra.mxu2 %v153_v29  ;;  %v141_v37 = vld [vmem:[%s1335_s3 + $0x220] sm:$0xff] }
   0xa   :  { %v768_v25 = vmin.f32 %v30_v20, 8.0  ;;  %v770_v26 = vmin.f32 %v29_v21, 8.0  ;;  %173 = vmatpush.msra.mxu0 %v139_v17  ;;  %240 = vmatpush.msra.mxu3 %v154_v30  ;;  %v142_v38 = vld [vmem:[%s1335_s3 + $0x228] sm:$0xff]  ;;  %v115_v39 = vld [vmem:[%s1335_s3 + $0x150] sm:$0xff]  ;;  %v116_v40 = vld [vmem:[%s1335_s3 + $0x158] sm:$0xff] }
   0xb   :  { %196 = vmatpush.msra.mxu1 %v140_v22  ;;  %218 = vmatpush.msra.mxu2 %v147_v33 }
   0xc   :  { %42 = vperm.xlu1 %652, %v768_v25   ;;  %37 = vperm.xlu0 %650, %v770_v26  }
   0xd   :  { %174 = vmatpush.msra.mxu0 %v133_v27  ;;  %197 = vmatpush.msra.mxu1 %v134_v28 }
   0xe   :  { %241 = vmatpush.msra.mxu3 %v148_v34 }
   0xf   :  { %175 = vmatpush.msra.mxu0 %v127_v31  ;;  %198 = vmatpush.msra.mxu1 %v128_v32 }
  0x10   :  { %10 = vsyncpa [#allocation3], 0  ;;  %219 = vmatpush.msra.mxu2 %v141_v37  ;;  %242 = vmatpush.msra.mxu3 %v142_v38  ;;  %v109_v41 = vld [vmem:[%s1335_s3 + $0x120] sm:$0xff]  ;;  %v110_v42 = vld [vmem:[%s1335_s3 + $0x128] sm:$0xff]  ;;  %v685_v43 = vmov 1   ;;  %vm623_vm0 = vcmask 261120  }
  0x11   :  { %176 = vmatpush.msra.mxu0 %v121_v35  ;;  %199 = vmatpush.msra.mxu1 %v122_v36  ;;  %v135_v44 = vld [vmem:[%s1335_s3 + $0x1f0] sm:$0xff]  ;;  %v136_v45 = vld [vmem:[%s1335_s3 + $0x1f8] sm:$0xff]  ;;  %v97_v48 = vld [vmem:[%s1335_s3 + $0xc0] sm:$0xff]  ;;  %s688_s10 = smov 128   ;;  %s689_s11 = smov 8  }
  0x12   :  { %v103_v46 = vld [vmem:[%s1335_s3 + $0xf0] sm:$0xff]  ;;  %v104_v47 = vld [vmem:[%s1335_s3 + $0xf8] sm:$0xff]  ;;  %v98_v49 = vld [vmem:[%s1335_s3 + $0xc8] sm:$0xff]  ;;  %220 = vmatpush.msra.mxu2 %v135_v44  ;;  %243 = vmatpush.msra.mxu3 %v136_v45 }
  0x13   :  { %177 = vmatpush.msra.mxu0 %v115_v39  ;;  %200 = vmatpush.msra.mxu1 %v116_v40  ;;  %v91_v50 = vld [vmem:[%s1335_s3 + $0x90] sm:$0xff]  ;;  %v92_v51 = vld [vmem:[%s1335_s3 + $0x98] sm:$0xff]  ;;  %v85_v52 = vld [vmem:[%s1335_s3 + $0x60] sm:$0xff] }
  0x14   :  { %653 = vset.pattern.permute.xlu1 %v685_v43  ;;  %651 = vset.pattern.permute.xlu0 %v685_v43  ;;  %v86_v53 = vld [vmem:[%s1335_s3 + $0x68] sm:$0xff]  ;;  %v129_v54 = vld [vmem:[%s1335_s3 + $0x1c0] sm:$0xff]  ;;  %v79_v56 = vld [vmem:[%s1335_s3 + $0x30] sm:$0xff] }
  0x15   :  { %60 = vperm.xlu1 %653, %v768_v25   ;;  %56 = vperm.xlu0 %651, %v770_v26   ;;  %v130_v55 = vld [vmem:[%s1335_s3 + $0x1c8] sm:$0xff]  ;;  %v80_v57 = vld [vmem:[%s1335_s3 + $0x38] sm:$0xff]  ;;  %v123_v58 = vld [vmem:[%s1335_s3 + $0x190] sm:$0xff] }
  0x16   :  { %178 = vmatpush.msra.mxu0 %v109_v41  ;;  %201 = vmatpush.msra.mxu1 %v110_v42  ;;  %v124_v59 = vld [vmem:[%s1335_s3 + $0x198] sm:$0xff]  ;;  %v73_v60 = vld [vmem:[%s1335_s3] sm:$0xff]  ;;  %v74_v61 = vld [vmem:[%s1335_s3 + $0x8] sm:$0xff] }
  0x17   :  { %221 = vmatpush.msra.mxu2 %v129_v54  ;;  %244 = vmatpush.msra.mxu3 %v130_v55  ;;  %v117_v62 = vld [vmem:[%s1335_s3 + $0x160] sm:$0xff]  ;;  %v118_v63 = vld [vmem:[%s1335_s3 + $0x168] sm:$0xff]  ;;  %v167_v0 = vld [vmem:[%s1335_s3 + $0x2f0] sm:$0xff] }
  0x18   :  { %179 = vmatpush.msra.mxu0 %v103_v46  ;;  %202 = vmatpush.msra.mxu1 %v104_v47  ;;  %v168_v1 = vld [vmem:[%s1335_s3 + $0x2f8] sm:$0xff]  ;;  %v111_v2 = vld [vmem:[%s1335_s3 + $0x130] sm:$0xff]  ;;  %v161_v4 = vld [vmem:[%s1335_s3 + $0x2c0] sm:$0xff] }
  0x19   :  { %222 = vmatpush.msra.mxu2 %v123_v58  ;;  %245 = vmatpush.msra.mxu3 %v124_v59  ;;  %v112_v3 = vld [vmem:[%s1335_s3 + $0x138] sm:$0xff]  ;;  %v162_v5 = vld [vmem:[%s1335_s3 + $0x2c8] sm:$0xff]  ;;  %v105_v6 = vld [vmem:[%s1335_s3 + $0x100] sm:$0xff] }
  0x1a   :  { %180 = vmatpush.msra.mxu0 %v97_v48  ;;  %203 = vmatpush.msra.mxu1 %v98_v49  ;;  %v106_v7 = vld [vmem:[%s1335_s3 + $0x108] sm:$0xff]  ;;  %v155_v8 = vld [vmem:[%s1335_s3 + $0x290] sm:$0xff]  ;;  %v156_v9 = vld [vmem:[%s1335_s3 + $0x298] sm:$0xff] }
  0x1b   :  { %223 = vmatpush.msra.mxu2 %v117_v62  ;;  %246 = vmatpush.msra.mxu3 %v118_v63  ;;  %v99_v10 = vld [vmem:[%s1335_s3 + $0xd0] sm:$0xff]  ;;  %v100_v11 = vld [vmem:[%s1335_s3 + $0xd8] sm:$0xff]  ;;  %v149_v12 = vld [vmem:[%s1335_s3 + $0x260] sm:$0xff] }
  0x1c   :  { %181 = vmatpush.msra.mxu0 %v91_v50  ;;  %204 = vmatpush.msra.mxu1 %v92_v51  ;;  %v150_v13 = vld [vmem:[%s1335_s3 + $0x268] sm:$0xff]  ;;  %v93_v14 = vld [vmem:[%s1335_s3 + $0xa0] sm:$0xff]  ;;  %v143_v16 = vld [vmem:[%s1335_s3 + $0x230] sm:$0xff] }
  0x1d   :  { %224 = vmatpush.msra.mxu2 %v111_v2  ;;  %247 = vmatpush.msra.mxu3 %v112_v3  ;;  %v94_v15 = vld [vmem:[%s1335_s3 + $0xa8] sm:$0xff]  ;;  %v144_v17 = vld [vmem:[%s1335_s3 + $0x238] sm:$0xff]  ;;  %v87_v18 = vld [vmem:[%s1335_s3 + $0x70] sm:$0xff] }
  0x1e   :  { %182 = vmatpush.msra.mxu0 %v85_v52  ;;  %205 = vmatpush.msra.mxu1 %v86_v53  ;;  %v88_v19 = vld [vmem:[%s1335_s3 + $0x78] sm:$0xff]  ;;  %v137_v20 = vld [vmem:[%s1335_s3 + $0x200] sm:$0xff]  ;;  %v138_v21 = vld [vmem:[%s1335_s3 + $0x208] sm:$0xff]  ;;  %v686_v52 = vmov 0  }
  0x1f   :  { %225 = vmatpush.msra.mxu2 %v105_v6  ;;  %248 = vmatpush.msra.mxu3 %v106_v7  ;;  %v81_v22 = vld [vmem:[%s1335_s3 + $0x40] sm:$0xff]  ;;  %v82_v23 = vld [vmem:[%s1335_s3 + $0x48] sm:$0xff]  ;;  %v131_v24 = vld [vmem:[%s1335_s3 + $0x1d0] sm:$0xff] }
  0x20   :  { %183 = vmatpush.msra.mxu0 %v79_v56  ;;  %206 = vmatpush.msra.mxu1 %v80_v57  ;;  %v132_v27 = vld [vmem:[%s1335_s3 + $0x1d8] sm:$0xff]  ;;  %v75_v28 = vld [vmem:[%s1335_s3 + $0x10] sm:$0xff]  ;;  %v125_v30 = vld [vmem:[%s1335_s3 + $0x1a0] sm:$0xff] }
  0x21   :  { %226 = vmatpush.msra.mxu2 %v99_v10  ;;  %249 = vmatpush.msra.mxu3 %v100_v11  ;;  %v76_v29 = vld [vmem:[%s1335_s3 + $0x18] sm:$0xff]  ;;  %v126_v31 = vld [vmem:[%s1335_s3 + $0x1a8] sm:$0xff]  ;;  %v119_v32 = vld [vmem:[%s1335_s3 + $0x170] sm:$0xff] }
  0x22   :  { %184 = vmatpush.msra.mxu0 %v73_v60  ;;  %207 = vmatpush.msra.mxu1 %v74_v61  ;;  %v120_v33 = vld [vmem:[%s1335_s3 + $0x178] sm:$0xff]  ;;  %v113_v34 = vld [vmem:[%s1335_s3 + $0x140] sm:$0xff]  ;;  %v114_v35 = vld [vmem:[%s1335_s3 + $0x148] sm:$0xff] }
  0x23   :  { %227 = vmatpush.msra.mxu2 %v93_v14  ;;  %250 = vmatpush.msra.mxu3 %v94_v15  ;;  %v107_v36 = vld [vmem:[%s1335_s3 + $0x110] sm:$0xff]  ;;  %v108_v37 = vld [vmem:[%s1335_s3 + $0x118] sm:$0xff]  ;;  %v101_v38 = vld [vmem:[%s1335_s3 + $0xe0] sm:$0xff] }
  0x24   :  { %261 = vmatpush.msrb.mxu0 %v167_v0  ;;  %284 = vmatpush.msrb.mxu1 %v168_v1  ;;  %v102_v39 = vld [vmem:[%s1335_s3 + $0xe8] sm:$0xff]  ;;  %v95_v40 = vld [vmem:[%s1335_s3 + $0xb0] sm:$0xff]  ;;  %v96_v41 = vld [vmem:[%s1335_s3 + $0xb8] sm:$0xff] }
  0x25   :  { %228 = vmatpush.msra.mxu2 %v87_v18  ;;  %251 = vmatpush.msra.mxu3 %v88_v19  ;;  %v89_v42 = vld [vmem:[%s1335_s3 + $0x80] sm:$0xff]  ;;  %v90_v43 = vld [vmem:[%s1335_s3 + $0x88] sm:$0xff]  ;;  %v83_v44 = vld [vmem:[%s1335_s3 + $0x50] sm:$0xff] }
  0x26   :  { %262 = vmatpush.msrb.mxu0 %v161_v4  ;;  %285 = vmatpush.msrb.mxu1 %v162_v5  ;;  %v84_v45 = vld [vmem:[%s1335_s3 + $0x58] sm:$0xff]  ;;  %v656_v46 = vld [vmem:[%s1333_s1] ss:$0 sm:$0xff]  ;;  %v78_v50 = vld [vmem:[%s1335_s3 + $0x28] sm:$0xff] }
  0x27   :  { %229 = vmatpush.msra.mxu2 %v81_v22  ;;  %252 = vmatpush.msra.mxu3 %v82_v23  ;;  %v77_v49 = vld [vmem:[%s1335_s3 + $0x20] sm:$0xff]  ;;  %v404_v62 = vld [vmem:[%s1336_s4 + $0x78] sm:$0xff]  ;;  %v419_v1 = vld [vmem:[%s1336_s4 + $0xf0] sm:$0xff]  ;;  %s632_s3 = sshll.u32 %s1337_s5, 4  ;;  %s633_s3 = int_to_ptr.hbm [resolvable:$true] %s632_s3 }
  0x28   :  { %263 = vmatpush.msrb.mxu0 %v155_v8  ;;  %286 = vmatpush.msrb.mxu1 %v156_v9  ;;  %v657_v53 = vld [vmem:[%s1333_s1 + $0x1] ss:$0 sm:$0xff]  ;;  %v420_v63 = vld [vmem:[%s1336_s4 + $0xf8] sm:$0xff]  ;;  %v402_v4 = vld [vmem:[%s1336_s4 + $0x68] sm:$0xff] }
  0x29   :  { %230 = vmatpush.msra.mxu2 %v75_v28  ;;  %253 = vmatpush.msra.mxu3 %v76_v29  ;;  %v418_v5 = vld [vmem:[%s1336_s4 + $0xe8] sm:$0xff]  ;;  %v401_v8 = vld [vmem:[%s1336_s4 + $0x60] sm:$0xff]  ;;  %v436_v14 = vld [vmem:[%s1336_s4 + $0x178] sm:$0xff] }
  0x2a   :  { %264 = vmatpush.msrb.mxu0 %v149_v12  ;;  %287 = vmatpush.msrb.mxu1 %v150_v13  ;;  %v400_v12 = vld [vmem:[%s1336_s4 + $0x58] sm:$0xff]  ;;  %v398_v22 = vld [vmem:[%s1336_s4 + $0x48] sm:$0xff]  ;;  %v397_v29 = vld [vmem:[%s1336_s4 + $0x40] sm:$0xff] }
  0x2b   :  { %654 = vset.pattern.permute.xlu2 %v686_v52  ;;  %655 = vset.pattern.permute.xlu0 %v686_v52  ;;  %v416_v13 = vld [vmem:[%s1336_s4 + $0xd8] sm:$0xff]  ;;  %v414_v23 = vld [vmem:[%s1336_s4 + $0xc8] sm:$0xff]  ;;  %v447_v52 = vld [vmem:[%s1336_s4 + $0x1d0] sm:$0xff] }
  0x2c   :  { %265 = vmatpush.msrb.mxu0 %v143_v16  ;;  %288 = vmatpush.msrb.mxu1 %v144_v17  ;;  %v452_v15 = vld [vmem:[%s1336_s4 + $0x1f8] sm:$0xff]  ;;  %v399_v16 = vld [vmem:[%s1336_s4 + $0x50] sm:$0xff] }
  0x2d   :  { %322 = vperm.xlu2 %654, %v770_v26   ;;  %485 = vmatpush.msrb.mxu2 %v404_v62  ;;  %v403_v26 = vld [vmem:[%s1336_s4 + $0x70] sm:$0xff]  ;;  %v482_v62 = vld [vmem:[%s1336_s4 + $0x2e8] sm:$0xff] }
  0x2e   :  { %266 = vmatpush.msrb.mxu0 %v137_v20  ;;  %289 = vmatpush.msrb.mxu1 %v138_v21  ;;  %v415_v17 = vld [vmem:[%s1336_s4 + $0xd0] sm:$0xff] }
  0x2f   :  { %508 = vmatpush.msrb.mxu3 %v420_v63  ;;  %486 = vmatpush.msrb.mxu2 %v403_v26  ;;  %v435_v20 = vld [vmem:[%s1336_s4 + $0x170] sm:$0xff]  ;;  %v428_v63 = vld [vmem:[%s1336_s4 + $0x138] sm:$0xff]  ;;  %v465_v26 = vld [vmem:[%s1336_s4 + $0x260] sm:$0xff] }
  0x30   :  { %267 = vmatpush.msrb.mxu0 %v131_v24  ;;  %290 = vmatpush.msrb.mxu1 %v132_v27  ;;  %v451_v21 = vld [vmem:[%s1336_s4 + $0x1f0] sm:$0xff]  ;;  %v434_v24 = vld [vmem:[%s1336_s4 + $0x168] sm:$0xff] }
  0x31   :  { %509 = vmatpush.msrb.mxu3 %v419_v1  ;;  %487 = vmatpush.msrb.mxu2 %v402_v4  ;;  %v450_v27 = vld [vmem:[%s1336_s4 + $0x1e8] sm:$0xff]  ;;  %v481_v1 = vld [vmem:[%s1336_s4 + $0x2e0] sm:$0xff]  ;;  %v464_v4 = vld [vmem:[%s1336_s4 + $0x258] sm:$0xff] }
  0x32   :  { %268 = vmatpush.msrb.mxu0 %v125_v30  ;;  %291 = vmatpush.msrb.mxu1 %v126_v31  ;;  %v413_v30 = vld [vmem:[%s1336_s4 + $0xc0] sm:$0xff]  ;;  %v396_v31 = vld [vmem:[%s1336_s4 + $0x38] sm:$0xff] }
  0x33   :  { %510 = vmatpush.msrb.mxu3 %v418_v5  ;;  %488 = vmatpush.msrb.mxu2 %v401_v8  ;;  %v480_v5 = vld [vmem:[%s1336_s4 + $0x2d8] sm:$0xff]  ;;  %v463_v8 = vld [vmem:[%s1336_s4 + $0x250] sm:$0xff] }
  0x34   :  { %269 = vmatpush.msrb.mxu0 %v119_v32  ;;  %292 = vmatpush.msrb.mxu1 %v120_v33  ;;  %v412_v32 = vld [vmem:[%s1336_s4 + $0xb8] sm:$0xff]  ;;  %v395_v33 = vld [vmem:[%s1336_s4 + $0x30] sm:$0xff] }
  0x35   :  { %326 = vperm.xlu2 %654, %v768_v25   ;;  %v417_v25 = vld [vmem:[%s1336_s4 + $0xe0] sm:$0xff]  ;;  %489 = vmatpush.msrb.mxu2 %v400_v12  ;;  %v478_v12 = vld [vmem:[%s1336_s4 + $0x2c8] sm:$0xff] }
  0x36   :  { %270 = vmatpush.msrb.mxu0 %v113_v34  ;;  %293 = vmatpush.msrb.mxu1 %v114_v35  ;;  %v411_v34 = vld [vmem:[%s1336_s4 + $0xb0] sm:$0xff]  ;;  %v394_v35 = vld [vmem:[%s1336_s4 + $0x28] sm:$0xff] }
  0x37   :  { %511 = vmatpush.msrb.mxu3 %v417_v25  ;;  %490 = vmatpush.msrb.mxu2 %v399_v16  ;;  %v479_v25 = vld [vmem:[%s1336_s4 + $0x2d0] sm:$0xff]  ;;  %v477_v16 = vld [vmem:[%s1336_s4 + $0x2c0] sm:$0xff] }
  0x38   :  { %271 = vmatpush.msrb.mxu0 %v107_v36  ;;  %294 = vmatpush.msrb.mxu1 %v108_v37  ;;  %v410_v36 = vld [vmem:[%s1336_s4 + $0xa8] sm:$0xff]  ;;  %v393_v37 = vld [vmem:[%s1336_s4 + $0x20] sm:$0xff] }
  0x39   :  { %512 = vmatpush.msrb.mxu3 %v416_v13  ;;  %491 = vmatpush.msrb.mxu2 %v398_v22  ;;  %v424_v13 = vld [vmem:[%s1336_s4 + $0x118] sm:$0xff]  ;;  %v438_v22 = vld [vmem:[%s1336_s4 + $0x188] sm:$0xff] }
  0x3a   :  { %272 = vmatpush.msrb.mxu0 %v101_v38  ;;  %295 = vmatpush.msrb.mxu1 %v102_v39  ;;  %v409_v38 = vld [vmem:[%s1336_s4 + $0xa0] sm:$0xff]  ;;  %v392_v39 = vld [vmem:[%s1336_s4 + $0x18] sm:$0xff] }
  0x3b   :  { %513 = vmatpush.msrb.mxu3 %v415_v17  ;;  %492 = vmatpush.msrb.mxu2 %v397_v29  ;;  %v423_v17 = vld [vmem:[%s1336_s4 + $0x110] sm:$0xff]  ;;  %v458_v29 = vld [vmem:[%s1336_s4 + $0x228] sm:$0xff] }
  0x3c   :  { %273 = vmatpush.msrb.mxu0 %v95_v40  ;;  %296 = vmatpush.msrb.mxu1 %v96_v41  ;;  %v408_v40 = vld [vmem:[%s1336_s4 + $0x98] sm:$0xff]  ;;  %v391_v41 = vld [vmem:[%s1336_s4 + $0x10] sm:$0xff] }
  0x3d   :  { %514 = vmatpush.msrb.mxu3 %v414_v23  ;;  %493 = vmatpush.msrb.mxu2 %v396_v31  ;;  %v459_v23 = vld [vmem:[%s1336_s4 + $0x230] sm:$0xff]  ;;  %v1291_v31 = vld [vmem:[%s1334_s2] sm:$0x3f] }
  0x3e   :  { %274 = vmatpush.msrb.mxu0 %v89_v42  ;;  %297 = vmatpush.msrb.mxu1 %v90_v43  ;;  %v407_v42 = vld [vmem:[%s1336_s4 + $0x90] sm:$0xff]  ;;  %v433_v43 = vld [vmem:[%s1336_s4 + $0x160] sm:$0xff] }
  0x3f   :  { %515 = vmatpush.msrb.mxu3 %v413_v30  ;;  %494 = vmatpush.msrb.mxu2 %v395_v33  ;;  %v474_v30 = vld [vmem:[%s1336_s4 + $0x2a8] sm:$0xff]  ;;  %v473_v33 = vld [vmem:[%s1336_s4 + $0x2a0] sm:$0xff] }
  0x40   :  { %275 = vmatpush.msrb.mxu0 %v83_v44  ;;  %298 = vmatpush.msrb.mxu1 %v84_v45  ;;  %v449_v44 = vld [vmem:[%s1336_s4 + $0x1e0] sm:$0xff]  ;;  %v390_v45 = vld [vmem:[%s1336_s4 + $0x8] sm:$0xff] }
  0x41   :  { %516 = vmatpush.msrb.mxu3 %v412_v32  ;;  %495 = vmatpush.msrb.mxu2 %v394_v35  ;;  %v457_v32 = vld [vmem:[%s1336_s4 + $0x220] sm:$0xff]  ;;  %v472_v35 = vld [vmem:[%s1336_s4 + $0x298] sm:$0xff] }
  0x42   :  { %276 = vmatpush.msrb.mxu0 %v77_v49  ;;  %299 = vmatpush.msrb.mxu1 %v78_v50  ;;  %v389_v49 = vld [vmem:[%s1336_s4] sm:$0xff] }
  0x43   :  { %517 = vmatpush.msrb.mxu3 %v411_v34  ;;  %496 = vmatpush.msrb.mxu2 %v393_v37  ;;  %v405_v50 = vld [vmem:[%s1336_s4 + $0x80] sm:$0xff]  ;;  %v456_v34 = vld [vmem:[%s1336_s4 + $0x218] sm:$0xff]  ;;  %v310_v37 = vperm.slane %v1291_v31, 1 }
  0x45   :  { %518 = vmatpush.msrb.mxu3 %v410_v36  ;;  %497 = vmatpush.msrb.mxu2 %v392_v39  ;;  %v309_v36 = vperm.slane %v1291_v31, 0  ;;  %v455_v39 = vld [vmem:[%s1336_s4 + $0x210] sm:$0xff] }
  0x47   :  { %519 = vmatpush.msrb.mxu3 %v409_v38  ;;  %498 = vmatpush.msrb.mxu2 %v391_v41  ;;  %v454_v41 = vld [vmem:[%s1336_s4 + $0x208] sm:$0xff] }
  0x49   :  { %520 = vmatpush.msrb.mxu3 %v408_v40  ;;  %499 = vmatpush.msrb.mxu2 %v390_v45  ;;  %v471_v40 = vld [vmem:[%s1336_s4 + $0x290] sm:$0xff]  ;;  %v453_v45 = vld [vmem:[%s1336_s4 + $0x200] sm:$0xff] }
  0x4b   :  { %521 = vmatpush.msrb.mxu3 %v407_v42  ;;  %500 = vmatpush.msrb.mxu2 %v389_v49  ;;  %v470_v42 = vld [vmem:[%s1336_s4 + $0x288] sm:$0xff]  ;;  %v311_v49 = vperm.slane %v1291_v31, 2 }
  0x7e   :  { %v38_v47 = vpop.permute.xlu0 %37  ;;  %v43_v48 = vpop.permute.xlu1 %42 }
  0x7f   :  { %v45_v51 = vsub.f32 %v656_v46, %v38_v47  ;;  %v46_v55 = vsub.f32 %v656_v46, %v43_v48  ;;  %v406_v46 = vld [vmem:[%s1336_s4 + $0x88] sm:$0xff]  ;;  %v432_v47 = vld [vmem:[%s1336_s4 + $0x158] sm:$0xff] }
  0x80   :  { %v448_v48 = vld [vmem:[%s1336_s4 + $0x1d8] sm:$0xff]  ;;  %522 = vmatpush.msrb.mxu3 %v406_v46  ;;  %v469_v46 = vld [vmem:[%s1336_s4 + $0x280] sm:$0xff] }
  0x81   :  { %v47_v54 = vand.u32 2147483647, %v45_v51  ;;  %v48_v0 = vand.u32 2147483647, %v46_v55  ;;  %v431_v51 = vld [vmem:[%s1336_s4 + $0x150] sm:$0xff]  ;;  %v430_v55 = vld [vmem:[%s1336_s4 + $0x148] sm:$0xff] }
  0x82   :  { %523 = vmatpush.msrb.mxu3 %v405_v50  ;;  %v312_v50 = vperm.slane %v1291_v31, 3 }
  0x83   :  { %v49_v60 = vsub.f32 1.0, %v47_v54  ;;  %v50_v9 = vsub.f32 1.0, %v48_v0  ;;  %v484_v54 = vld [vmem:[%s1336_s4 + $0x2f8] sm:$0xff] }
  0x84   :  { %v444_v0 = vld [vmem:[%s1336_s4 + $0x1b8] sm:$0xff] }
  0x85   :  { %v51_v6 = vmax.f32 %v49_v60, 0.0  ;;  %v52_v18 = vmax.f32 %v50_v9, 0.0  ;;  %v445_v60 = vld [vmem:[%s1336_s4 + $0x1c0] sm:$0xff] }
  0x86   :  { %v425_v9 = vld [vmem:[%s1336_s4 + $0x120] sm:$0xff] }
  0x87   :  { %v61_v56 = vpop.permute.xlu1 %60  ;;  %v57_v57 = vpop.permute.xlu0 %56 }
  0x88   :  { %v64_v58 = vsub.f32 %v657_v53, %v61_v56  ;;  %v63_v59 = vsub.f32 %v657_v53, %v57_v57  ;;  %v468_v53 = vld [vmem:[%s1336_s4 + $0x278] sm:$0xff]  ;;  %v446_v56 = vld [vmem:[%s1336_s4 + $0x1c8] sm:$0xff]  ;;  %v467_v57 = vld [vmem:[%s1336_s4 + $0x270] sm:$0xff]  ;;  %v323_v38 = vpop.permute.xlu2 %322 }
  0x8a   :  { %v65_v61 = vand.u32 2147483647, %v63_v59  ;;  %v66_v2 = vand.u32 2147483647, %v64_v58  ;;  %v483_v58 = vld [vmem:[%s1336_s4 + $0x2f0] sm:$0xff]  ;;  %v429_v59 = vld [vmem:[%s1336_s4 + $0x140] sm:$0xff] }
  0x8c   :  { %v67_v3 = vsub.f32 1.0, %v65_v61  ;;  %v68_v10 = vsub.f32 1.0, %v66_v2  ;;  %v466_v61 = vld [vmem:[%s1336_s4 + $0x268] sm:$0xff]  ;;  %v427_v2 = vld [vmem:[%s1336_s4 + $0x130] sm:$0xff] }
  0x8e   :  { %v69_v7 = vmax.f32 %v67_v3, 0.0  ;;  %v70_v19 = vmax.f32 %v68_v10, 0.0  ;;  %v443_v3 = vld [vmem:[%s1336_s4 + $0x1b0] sm:$0xff]  ;;  %v441_v10 = vld [vmem:[%s1336_s4 + $0x1a0] sm:$0xff] }
  0x90   :  { %v71_v11 = vmul.f32 %v69_v7, %v51_v6  ;;  %v72_v28 = vmul.f32 %v70_v19, %v52_v18  ;;  %v426_v6 = vld [vmem:[%s1336_s4 + $0x128] sm:$0xff]  ;;  %v439_v18 = vld [vmem:[%s1336_s4 + $0x190] sm:$0xff]  ;;  %v460_v19 = vld [vmem:[%s1336_s4 + $0x238] sm:$0xff] }
  0x91   :  { %v442_v7 = vld [vmem:[%s1336_s4 + $0x1a8] sm:$0xff] }
  0x92   :  { %185 = vmatmul.f32.vlgmr.msra.gmra.mxu0 %v71_v11  ;;  %208 = vmatmul.f32.vlgmr.msra.gmra.mxu1 %v71_v11 }
  0x93   :  { %231 = vmatmul.f32.vlgmr.msra.gmra.mxu2 %v71_v11  ;;  %254 = vmatmul.f32.vlgmr.msra.gmra.mxu3 %v71_v11 }
  0x94   :  { %531 = vmatpush.msra.mxu0 %v436_v14  ;;  %554 = vmatpush.msra.mxu1 %v452_v15  ;;  %v440_v14 = vld [vmem:[%s1336_s4 + $0x198] sm:$0xff]  ;;  %v461_v15 = vld [vmem:[%s1336_s4 + $0x240] sm:$0xff] }
  0x95   :  { %577 = vmatpush.msra.mxu2 %v468_v53  ;;  %600 = vmatpush.msra.mxu3 %v484_v54  ;;  %v331_v54 = vsub.f32 %v311_v49, %v323_v38 }
  0x96   :  { %532 = vmatpush.msra.mxu0 %v435_v20  ;;  %555 = vmatpush.msra.mxu1 %v451_v21  ;;  %v476_v20 = vld [vmem:[%s1336_s4 + $0x2b8] sm:$0xff]  ;;  %v422_v21 = vld [vmem:[%s1336_s4 + $0x108] sm:$0xff] }
  0x97   :  { %578 = vmatpush.msra.mxu2 %v467_v57  ;;  %601 = vmatpush.msra.mxu3 %v483_v58 }
  0x98   :  { %533 = vmatpush.msra.mxu0 %v434_v24  ;;  %556 = vmatpush.msra.mxu1 %v450_v27  ;;  %v475_v24 = vld [vmem:[%s1336_s4 + $0x2b0] sm:$0xff]  ;;  %v421_v27 = vld [vmem:[%s1336_s4 + $0x100] sm:$0xff] }
  0x99   :  { %579 = vmatpush.msra.mxu2 %v466_v61  ;;  %602 = vmatpush.msra.mxu3 %v482_v62 }
  0x9a   :  { %188 = vmatmul.f32.gmra.mxu0 %v72_v28  ;;  %211 = vmatmul.f32.gmra.mxu1 %v72_v28 }
  0x9b   :  { %234 = vmatmul.f32.gmra.mxu2 %v72_v28  ;;  %257 = vmatmul.f32.gmra.mxu3 %v72_v28 }
  0x9c   :  { %534 = vmatpush.msra.mxu0 %v433_v43  ;;  %557 = vmatpush.msra.mxu1 %v449_v44  ;;  %v329_v43 = vsub.f32 %v309_v36, %v323_v38  ;;  %v330_v44 = vsub.f32 %v310_v37, %v323_v38 }
  0x9d   :  { %580 = vmatpush.msra.mxu2 %v465_v26  ;;  %603 = vmatpush.msra.mxu3 %v481_v1  ;;  %v314_v26 = vperm.slane %v1291_v31, 5 }
  0x9e   :  { %535 = vmatpush.msra.mxu0 %v432_v47  ;;  %558 = vmatpush.msra.mxu1 %v448_v48  ;;  %v341_v47 = vand.u32 2147483647, %v329_v43  ;;  %v342_v48 = vand.u32 2147483647, %v330_v44 }
  0x9f   :  { %581 = vmatpush.msra.mxu2 %v464_v4  ;;  %604 = vmatpush.msra.mxu3 %v480_v5 }
  0xa0   :  { %536 = vmatpush.msra.mxu0 %v431_v51  ;;  %559 = vmatpush.msra.mxu1 %v447_v52  ;;  %v327_v51 = vpop.permute.xlu2 %326  ;;  %v353_v52 = vsub.f32 1.0, %v341_v47  ;;  %v354_v53 = vsub.f32 1.0, %v342_v48 }
  0xa1   :  { %582 = vmatpush.msra.mxu2 %v463_v8  ;;  %605 = vmatpush.msra.mxu3 %v479_v25  ;;  %v336_v57 = vsub.f32 %v310_v37, %v327_v51  ;;  %v338_v8 = vsub.f32 %v312_v50, %v327_v51 }
  0xa2   :  { %277 = vmatmul.f32.vlgmr.msrb.gmra.mxu0 %v71_v11  ;;  %300 = vmatmul.f32.vlgmr.msrb.gmra.mxu1 %v71_v11  ;;  %v462_v11 = vld [vmem:[%s1336_s4 + $0x248] sm:$0xff]  ;;  %v365_v58 = vmax.f32 %v353_v52, 0.0 }
  0xa3   :  { %537 = vmatpush.msra.mxu0 %v430_v55  ;;  %560 = vmatpush.msra.mxu1 %v446_v56  ;;  %v332_v55 = vsub.f32 %v312_v50, %v323_v38  ;;  %v335_v56 = vsub.f32 %v309_v36, %v327_v51 }
  0xa4   :  { %583 = vmatpush.msra.mxu2 %v462_v11  ;;  %606 = vmatpush.msra.mxu3 %v478_v12  ;;  %v334_v11 = vsub.f32 %v314_v26, %v323_v38 }
  0xa5   :  { %538 = vmatpush.msra.mxu0 %v429_v59  ;;  %561 = vmatpush.msra.mxu1 %v445_v60  ;;  %v366_v59 = vmax.f32 %v354_v53, 0.0  ;;  %v343_v60 = vand.u32 2147483647, %v331_v54  ;;  %v344_v61 = vand.u32 2147483647, %v332_v55 }
  0xa6   :  { %584 = vmatpush.msra.mxu2 %v461_v15  ;;  %607 = vmatpush.msra.mxu3 %v477_v16  ;;  %v347_v62 = vand.u32 2147483647, %v335_v56  ;;  %v350_v15 = vand.u32 2147483647, %v338_v8 }
  0xa7   :  { %539 = vmatpush.msra.mxu0 %v428_v63  ;;  %562 = vmatpush.msra.mxu1 %v444_v0  ;;  %v348_v63 = vand.u32 2147483647, %v336_v57  ;;  %v313_v0 = vperm.slane %v1291_v31, 4  ;;  %v355_v5 = vsub.f32 1.0, %v343_v60 }
  0xa8   :  { %585 = vmatpush.msra.mxu2 %v460_v19  ;;  %608 = vmatpush.msra.mxu3 %v476_v20  ;;  %v359_v25 = vsub.f32 1.0, %v347_v62  ;;  %v362_v31 = vsub.f32 1.0, %v350_v15 }
  0xa9   :  { %540 = vmatpush.msra.mxu0 %v427_v2  ;;  %563 = vmatpush.msra.mxu1 %v443_v3  ;;  %v367_v12 = vmax.f32 %v355_v5, 0.0 }
  0xaa   :  { %280 = vmatmul.f32.gmra.mxu0 %v72_v28  ;;  %303 = vmatmul.f32.gmra.mxu1 %v72_v28  ;;  %v437_v28 = vld [vmem:[%s1336_s4 + $0x180] sm:$0xff]  ;;  %v374_v37 = vmax.f32 %v362_v31, 0.0  ;;  %s687_s4 = smov [#allocation2]  }
  0xab   :  { %541 = vmatpush.msra.mxu0 %v426_v6  ;;  %564 = vmatpush.msra.mxu1 %v442_v7  ;;  %v356_v6 = vsub.f32 1.0, %v344_v61  ;;  %v337_v7 = vsub.f32 %v311_v49, %v327_v51  ;;  %s630_s7 = sshll.u32 %s687_s4, 4  ;;  %s631_s7 = int_to_ptr.vmem [resolvable:$true] %s630_s7 }
  0xac   :  { %586 = vmatpush.msra.mxu2 %v459_v23  ;;  %609 = vmatpush.msra.mxu3 %v475_v24 }
  0xad   :  { %542 = vmatpush.msra.mxu0 %v425_v9  ;;  %565 = vmatpush.msra.mxu1 %v441_v10  ;;  %v360_v9 = vsub.f32 1.0, %v348_v63  ;;  %v333_v10 = vsub.f32 %v313_v0, %v323_v38 }
  0xae   :  { %587 = vmatpush.msra.mxu2 %v458_v29  ;;  %610 = vmatpush.msra.mxu3 %v474_v30 }
  0xaf   :  { %543 = vmatpush.msra.mxu0 %v424_v13  ;;  %566 = vmatpush.msra.mxu1 %v440_v14  ;;  %v368_v13 = vmax.f32 %v356_v6, 0.0  ;;  %v349_v14 = vand.u32 2147483647, %v337_v7  ;;  %v372_v19 = vmax.f32 %v360_v9, 0.0  ;;  %v345_v20 = vand.u32 2147483647, %v333_v10 }
  0xb0   :  { %588 = vmatpush.msra.mxu2 %v457_v32  ;;  %611 = vmatpush.msra.mxu3 %v473_v33 }
  0xb1   :  { %544 = vmatpush.msra.mxu0 %v423_v17  ;;  %567 = vmatpush.msra.mxu1 %v439_v18  ;;  %v371_v18 = vmax.f32 %v359_v25, 0.0  ;;  %v361_v30 = vsub.f32 1.0, %v349_v14  ;;  %v357_v32 = vsub.f32 1.0, %v345_v20 }
  0xb2   :  { %589 = vmatpush.msra.mxu2 %v456_v34  ;;  %612 = vmatpush.msra.mxu3 %v472_v35  ;;  %v339_v34 = vsub.f32 %v313_v0, %v327_v51  ;;  %v340_v35 = vsub.f32 %v314_v26, %v327_v51 }
  0xb3   :  { %545 = vmatpush.msra.mxu0 %v422_v21  ;;  %568 = vmatpush.msra.mxu1 %v438_v22  ;;  %v346_v21 = vand.u32 2147483647, %v334_v11  ;;  %v373_v36 = vmax.f32 %v361_v30, 0.0 }
  0xb4   :  { %590 = vmatpush.msra.mxu2 %v455_v39  ;;  %613 = vmatpush.msra.mxu3 %v471_v40  ;;  %v369_v40 = vmax.f32 %v357_v32, 0.0  ;;  %v352_v43 = vand.u32 2147483647, %v340_v35 }
  0xb5   :  { %546 = vmatpush.msra.mxu0 %v421_v27  ;;  %569 = vmatpush.msra.mxu1 %v437_v28  ;;  %v358_v33 = vsub.f32 1.0, %v346_v21 }
  0xb6   :  { %591 = vmatpush.msra.mxu2 %v454_v41  ;;  %614 = vmatpush.msra.mxu3 %v470_v42  ;;  %v351_v42 = vand.u32 2147483647, %v339_v34  ;;  %v364_v51 = vsub.f32 1.0, %v352_v43 }
  0xb7   :  { %v370_v41 = vmax.f32 %v358_v33, 0.0 }
  0xb8   :  { %592 = vmatpush.msra.mxu2 %v453_v45  ;;  %615 = vmatpush.msra.mxu3 %v469_v46  ;;  %v363_v50 = vsub.f32 1.0, %v351_v42  ;;  %v376_v53 = vmax.f32 %v364_v51, 0.0 }
  0xba   :  { %v375_v52 = vmax.f32 %v363_v50, 0.0 }
 0x10f   :  { %v186_v1 = vpop.f32.mrf.mxu0  ;;  %v209_v2 = vpop.f32.mrf.mxu1 }
 0x110   :  { %v377_v3 = vmul.f32 %v365_v58, %v186_v1  ;;  %v378_v4 = vmul.f32 %v366_v59, %v209_v2 }
 0x112   :  { %501 = vmatmul.f32.vlgmr.msrb.gmra.mxu2 %v377_v3  ;;  %524 = vmatmul.f32.vlgmr.msrb.gmra.mxu3 %v378_v4 }
 0x116   :  { %v232_v16 = vpop.f32.mrf.mxu2  ;;  %v255_v17 = vpop.f32.mrf.mxu3 }
 0x117   :  { %v379_v22 = vmul.f32 %v367_v12, %v232_v16  ;;  %v380_v23 = vmul.f32 %v368_v13, %v255_v17  ;;  %v189_v24 = vpop.f32.mrf.mxu0  ;;  %v212_v27 = vpop.f32.mrf.mxu1 }
 0x118   :  { %v383_v28 = vmul.f32 %v371_v18, %v189_v24  ;;  %v384_v29 = vmul.f32 %v372_v19, %v212_v27 }
 0x119   :  { %547 = vmatmul.f32.vlgmr.msra.gmra.mxu0 %v379_v22  ;;  %570 = vmatmul.f32.vlgmr.msra.gmra.mxu1 %v380_v23 }
 0x11a   :  { %504 = vmatmul.f32.gmra.mxu2 %v383_v28  ;;  %527 = vmatmul.f32.gmra.mxu3 %v384_v29 }
 0x11e   :  { %v235_v38 = vpop.f32.mrf.mxu2  ;;  %v258_v39 = vpop.f32.mrf.mxu3 }
 0x11f   :  { %v385_v44 = vmul.f32 %v373_v36, %v235_v38  ;;  %v386_v45 = vmul.f32 %v374_v37, %v258_v39  ;;  %v278_v46 = vpop.f32.mrf.mxu0  ;;  %v301_v47 = vpop.f32.mrf.mxu1 }
 0x120   :  { %v381_v48 = vmul.f32 %v369_v40, %v278_v46  ;;  %v382_v49 = vmul.f32 %v370_v41, %v301_v47 }
 0x121   :  { %550 = vmatmul.f32.gmra.mxu0 %v385_v44  ;;  %573 = vmatmul.f32.gmra.mxu1 %v386_v45 }
 0x122   :  { %593 = vmatmul.f32.vlgmr.msra.gmra.mxu2 %v381_v48  ;;  %616 = vmatmul.f32.vlgmr.msra.gmra.mxu3 %v382_v49 }
 0x127   :  { %v281_v54 = vpop.f32.mrf.mxu0  ;;  %v304_v55 = vpop.f32.mrf.mxu1 }
 0x128   :  { %v387_v56 = vmul.f32 %v375_v52, %v281_v54  ;;  %v388_v57 = vmul.f32 %v376_v53, %v304_v55 }
 0x12a   :  { %596 = vmatmul.f32.gmra.mxu2 %v387_v56  ;;  %619 = vmatmul.f32.gmra.mxu3 %v388_v57 }
 0x195   :  { %v502_v58 = vpop.f32.mrf.mxu2  ;;  %v525_v59 = vpop.f32.mrf.mxu3 }
 0x196   :  { %v526_v60 = vadd.f32 %v525_v59, %v502_v58  ;;  %v548_v61 = vpop.f32.mrf.mxu0  ;;  %v571_v26 = vpop.f32.mrf.mxu1 }
 0x198   :  { %v549_v0 = vadd.f32 %v548_v61, %v526_v60 }
 0x19a   :  { %v572_v1 = vadd.f32 %v571_v26, %v549_v0 }
 0x19d   :  { %v505_v62 = vpop.f32.mrf.mxu2  ;;  %v528_v63 = vpop.f32.mrf.mxu3 }
 0x19e   :  { %v529_v2 = vadd.f32 %v528_v63, %v505_v62  ;;  %v551_v6 = vpop.f32.mrf.mxu0  ;;  %v574_v25 = vpop.f32.mrf.mxu1 }
 0x1a0   :  { %v552_v7 = vadd.f32 %v551_v6, %v529_v2 }
 0x1a2   :  { %v575_v9 = vadd.f32 %v574_v25, %v552_v7 }
 0x1a5   :  { %v594_v3 = vpop.f32.mrf.mxu2  ;;  %v617_v4 = vpop.f32.mrf.mxu3 }
 0x1a6   :  { %v595_v5 = vadd.f32 %v594_v3, %v572_v1 }
 0x1a8   :  { %v618_v8 = vadd.f32 %v617_v4, %v595_v5 }
 0x1aa   :  { %624 = vst.msk [vmem:[#allocation2] sm:$0xff] %vm623_vm0, %v618_v8 }
 0x1ad   :  { %v597_v10 = vpop.f32.mrf.mxu2  ;;  %v620_v12 = vpop.f32.mrf.mxu3 }
 0x1ae   :  { %v598_v11 = vadd.f32 %v597_v10, %v575_v9 }
 0x1b0   :  { %v621_v13 = vadd.f32 %v620_v12, %v598_v11 }
 0x1b2   :  { %625 = vst.msk [vmem:[#allocation2 + $0x8] sm:$0xff] %vm623_vm0, %v621_v13 }
 0x1b3   :  { %638 = dma.vmem_to_hbm [thread:$0]  %s631_s7, 256, %s633_s3, [#allocation3], %s688_s10, %s688_s10, %s689_s11  }
 0x1b4   :  { %682 = dma.done.wait [#allocation3], 256  }
 0x1b5   :  { %683 = vsyncadd [#allocation3], 4294967040 }
 0x1b6   :  { %643 = vsyncpa [#allocation3], 1 }

</bundles_post_ra>
